<compile_context>
chip_gen: v7x
topology: tpu7x:2x2x1
jax: 0.10.0
libtpu: 0.0.40
codegen_flags: <defaults>
</compile_context>

<pallas_src>
import functools

import jax
import jax.numpy as jnp
from jax.experimental import pallas as pl
from jax.experimental.pallas import tpu as pltpu


def _dilconv_kernel(x_ref, wf_ref, shift_ref, o_ref, xp_ref, *,
                    k, stride, dilation, padding, h, w, rt, w_out, c_in, c_out):
    """One (image, output-row-tile) grid step.

    x_ref:     (1, H, W, C_in)        unpadded NHWC image (same block for all row tiles)
    wf_ref:    (k*k, C_out, C_in)     fused depthwise * pointwise * BN-scale weights
    shift_ref: (C_out, 1)             folded BatchNorm shift
    o_ref:     (1, C_out, rt*w_out)   lane-dense output tile (spatial on lanes)
    xp_ref:    (H+2p, W+2p, C_in)     persistent VMEM scratch: ReLU'd, zero-padded image
    """
    r = pl.program_id(1)

    # Fill the ReLU'd, zero-padded image into VMEM once per image (row tile 0).
    @pl.when(r == 0)
    def _fill():
        if padding > 0:
            xp_ref[...] = jnp.zeros_like(xp_ref)          # zero the pad border
        xp_ref[pl.ds(padding, h), pl.ds(padding, w), :] = jnp.maximum(
            x_ref[0].astype(jnp.float32), 0.0)

    def _ds(start, size):
        if stride == 1:
            return pl.ds(start, size)
        return pl.ds(start, size, stride=stride)

    hw_t = rt * w_out
    row0 = r * (rt * stride)

    # k*k accumulating MXU matmuls with fused weights:
    #   y[co, p] += sum_ci wf[t, co, ci] * relu(x_pad)[tap_t(p), ci]
    y = jnp.zeros((c_out, hw_t), jnp.float32)
    for kh in range(k):
        for kw in range(k):
            tap = xp_ref[_ds(row0 + kh * dilation, rt),
                         _ds(kw * dilation, w_out), :]     # (rt, w_out, C_in)
            tap2 = tap.reshape(hw_t, c_in)
            y = y + jax.lax.dot_general(
                wf_ref[kh * k + kw], tap2,
                (((1,), (1,)), ((), ())),                  # contract over C_in
                preferred_element_type=jnp.float32)        # -> (C_out, hw_t)

    y = y + shift_ref[...]                                 # folded BatchNorm shift
    o_ref[0] = y.astype(o_ref.dtype)


def dil_conv_forward(x, w_dw, w_pw, gamma, beta, running_mean, running_var,
                     *, stride, padding, dilation, eps=1e-5):
    """DilConv.forward (inference BatchNorm) for NCHW x; weights in PyTorch layouts."""
    n, c_in, h, w = x.shape
    c_out = w_pw.shape[0]
    k = w_dw.shape[-1]
    h_out = (h + 2 * padding - dilation * (k - 1) - 1) // stride + 1
    w_out = (w + 2 * padding - dilation * (k - 1) - 1) // stride + 1

    # --- thin JAX glue ------------------------------------------------------
    # TODO(synk): fold the input NCHW->NHWC transpose into the kernel as well;
    # it is kept as one XLA op so the strided depthwise tap reads stay on the
    # well-supported major/sublane axes (channels on lanes).
    x_nhwc = jnp.transpose(x, (0, 2, 3, 1))

    # Fold depthwise taps + 1x1 pointwise + BN scale into one per-tap weight and
    # BN mean/beta into a single shift (inference running statistics).
    # TODO(synk): training-mode BatchNorm (batch statistics) is not supported.
    scale = gamma / jnp.sqrt(running_var + eps)                     # (C_out,)
    shift = (beta - running_mean * scale).reshape(c_out, 1)         # (C_out, 1)
    wdw = w_dw.reshape(c_in, k * k)                                 # (C_in, k*k)
    wpw = w_pw.reshape(c_out, c_in)                                 # (C_out, C_in)
    wf = (wdw.T[:, None, :] * wpw[None, :, :]) * scale[None, :, None]
    wf = wf.astype(jnp.float32)                                     # (k*k, C_out, C_in)

    # Output row tiling: the most row tiles whose flattened spatial width is
    # still a whole number of 128-lane tiles (keeps every store lane-dense).
    n_rt = 1
    for cand in range(h_out, 1, -1):
        if h_out % cand == 0 and ((h_out // cand) * w_out) % 128 == 0:
            n_rt = cand
            break
    rt = h_out // n_rt

    kernel = functools.partial(
        _dilconv_kernel, k=k, stride=stride, dilation=dilation, padding=padding,
        h=h, w=w, rt=rt, w_out=w_out, c_in=c_in, c_out=c_out)

    out_flat = pl.pallas_call(
        kernel,
        out_shape=jax.ShapeDtypeStruct((n, c_out, h_out * w_out), x.dtype),
        grid_spec=pltpu.PrefetchScalarGridSpec(
            num_scalar_prefetch=0,
            grid=(n, n_rt),
            in_specs=[
                pl.BlockSpec((1, h, w, c_in), lambda b, r: (b, 0, 0, 0)),
                pl.BlockSpec((k * k, c_out, c_in), lambda b, r: (0, 0, 0)),
                pl.BlockSpec((c_out, 1), lambda b, r: (0, 0)),
            ],
            out_specs=pl.BlockSpec((1, c_out, rt * w_out), lambda b, r: (b, 0, r)),
            scratch_shapes=[
                pltpu.VMEM((h + 2 * padding, w + 2 * padding, c_in), jnp.float32),
            ],
        ),
        compiler_params=pltpu.CompilerParams(
            dimension_semantics=("parallel", "arbitrary"),
            vmem_limit_bytes=32 * 1024 * 1024),
    )(x_nhwc, wf, shift)

    # Free reshape (contiguous dims, no transpose): (N, C_out, HW) -> NCHW.
    return out_flat.reshape(n, c_out, h_out, w_out)


def _dil_conv_ref(x, w_dw, w_pw, gamma, beta, mean, var,
                  *, stride, padding, dilation, eps=1e-5):
    """Pure-JAX reference mirroring the PyTorch module (inference BN)."""
    c_in = x.shape[1]
    y = jnp.maximum(x, 0.0)
    y = jax.lax.conv_general_dilated(
        y, w_dw, window_strides=(stride, stride),
        padding=[(padding, padding), (padding, padding)],
        rhs_dilation=(dilation, dilation),
        dimension_numbers=("NCHW", "OIHW", "NCHW"),
        feature_group_count=c_in)
    y = jax.lax.conv_general_dilated(
        y, w_pw, window_strides=(1, 1), padding="VALID",
        dimension_numbers=("NCHW", "OIHW", "NCHW"))
    scale = gamma / jnp.sqrt(var + eps)
    shift = beta - mean * scale
    return y * scale[None, :, None, None] + shift[None, :, None, None]


if __name__ == "__main__":
    key = jax.random.PRNGKey(0)
    kx, kd, kp, kg, kb, km, kv = jax.random.split(key, 7)

    N, C_in, C_out, H, W = 2, 4, 8, 16, 16
    k, padding, dilation = 3, 2, 2                   # DARTS dil_conv_3x3

    x = jax.random.normal(kx, (N, C_in, H, W), dtype=jnp.float32)
    w_dw = jax.random.normal(kd, (C_in, 1, k, k), dtype=jnp.float32) * 0.3
    w_pw = jax.random.normal(kp, (C_out, C_in, 1, 1), dtype=jnp.float32) * 0.3
    gamma = 1.0 + 0.1 * jax.random.normal(kg, (C_out,), dtype=jnp.float32)
    beta = 0.1 * jax.random.normal(kb, (C_out,), dtype=jnp.float32)
    running_mean = 0.05 * jax.random.normal(km, (C_out,), dtype=jnp.float32)
    running_var = 1.0 + 0.1 * jnp.abs(jax.random.normal(kv, (C_out,), dtype=jnp.float32))

    for stride in (1, 2):
        y = dil_conv_forward(x, w_dw, w_pw, gamma, beta, running_mean,
                             running_var, stride=stride, padding=padding,
                             dilation=dilation)
        jax.block_until_ready(y)
        y_ref = _dil_conv_ref(x, w_dw, w_pw, gamma, beta, running_mean,
                              running_var, stride=stride, padding=padding,
                              dilation=dilation)
        assert y.shape == y_ref.shape, (y.shape, y_ref.shape)
        assert bool(jnp.allclose(y, y_ref, rtol=1e-2, atol=1e-2)), \
            float(jnp.max(jnp.abs(y - y_ref)))

    print("KERNEL_OK")
</pallas_src>

<mosaic_0001>
module attributes {stable_mosaic.version = 11 : i64} {
  func.func @_dilconv_kernel(%arg0: i32, %arg1: i32, %arg2: memref<1x16x16x4xf32, #tpu.memory_space<vmem>>, %arg3: memref<9x8x4xf32, #tpu.memory_space<vmem>>, %arg4: memref<8x1xf32, #tpu.memory_space<vmem>>, %arg5: memref<1x8x128xf32, #tpu.memory_space<vmem>>, %arg6: memref<20x20x4xf32, #tpu.memory_space<vmem>>) attributes {dimension_semantics = [#tpu.dimension_semantics<parallel>, #tpu.dimension_semantics<arbitrary>], iteration_bounds = array<i64: 2, 2>, scalar_prefetch = 0 : i64, scratch_operands = 1 : i64, tpu.core_type = #tpu.core_type<tc>, window_params = [{transform_indices = @transform_0, window_bounds = array<i64: 1, 16, 16, 4>}, {pipeline_mode = #tpu.pipeline_mode<synchronous>, transform_indices = @transform_1, window_bounds = array<i64: 9, 8, 4>}, {pipeline_mode = #tpu.pipeline_mode<synchronous>, transform_indices = @transform_2, window_bounds = array<i64: 8, 1>}, {transform_indices = @transform_3, window_bounds = array<i64: 1, 8, 128>}]} {
    %c0_i32 = arith.constant 0 : i32
    %0 = arith.cmpi eq, %arg1, %c0_i32 : i32
    %1 = arith.extui %0 : i1 to i32
    %c0_i32_0 = arith.constant 0 : i32
    %2 = arith.cmpi ne, %1, %c0_i32_0 : i32
    scf.if %2 {
      %cst_58 = arith.constant 0.000000e+00 : f32
      %83 = vector.broadcast %cst_58 : f32 to vector<20x20x4xf32>
      %c0_59 = arith.constant 0 : index
      %c0_60 = arith.constant 0 : index
      %c0_61 = arith.constant 0 : index
      %84 = vector.load %arg6[%c0_59, %c0_60, %c0_61] : memref<20x20x4xf32, #tpu.memory_space<vmem>>, vector<20x20x4xf32>
      tpu.vector_store %arg6[%c0_59, %c0_60, %c0_61], %83 {strides = array<i32>} : memref<20x20x4xf32, #tpu.memory_space<vmem>>, vector<20x20x4xf32>,
      %c0_62 = arith.constant 0 : index
      %c0_63 = arith.constant 0 : index
      %c0_64 = arith.constant 0 : index
      %c0_65 = arith.constant 0 : index
      %85 = vector.load %arg2[%c0_62, %c0_63, %c0_64, %c0_65] : memref<1x16x16x4xf32, #tpu.memory_space<vmem>>, vector<1x16x16x4xf32>
      %86 = vector.shape_cast %85 : vector<1x16x16x4xf32> to vector<16x16x4xf32>
      %cst_66 = arith.constant 0.000000e+00 : f32
      %87 = vector.broadcast %cst_66 : f32 to vector<16x16x4xf32>
      %88 = arith.maximumf %86, %87 : vector<16x16x4xf32>
      %c2_67 = arith.constant 2 : index
      %c2_68 = arith.constant 2 : index
      %c0_69 = arith.constant 0 : index
      %89 = vector.load %arg6[%c2_67, %c2_68, %c0_69] : memref<20x20x4xf32, #tpu.memory_space<vmem>>, vector<16x16x4xf32>
      tpu.vector_store %arg6[%c2_67, %c2_68, %c0_69], %88 {strides = array<i32>} : memref<20x20x4xf32, #tpu.memory_space<vmem>>, vector<16x16x4xf32>,
    } else {
    }
    %c8_i32 = arith.constant 8 : i32
    %3 = arith.muli %arg1, %c8_i32 : i32
    %cst = arith.constant 0.000000e+00 : f32
    %4 = vector.broadcast %cst : f32 to vector<8x128xf32>
    %c0_i32_1 = arith.constant 0 : i32
    %5 = arith.addi %3, %c0_i32_1 : i32
    %6 = arith.index_cast %5 : i32 to index
    %c0 = arith.constant 0 : index
    %c0_2 = arith.constant 0 : index
    %7 = vector.load %arg6[%6, %c0, %c0_2] : memref<20x20x4xf32, #tpu.memory_space<vmem>>, vector<8x16x4xf32>
    %8 = vector.shape_cast %7 : vector<8x16x4xf32> to vector<128x4xf32>
    %c0_3 = arith.constant 0 : index
    %c0_4 = arith.constant 0 : index
    %c0_5 = arith.constant 0 : index
    %9 = vector.load %arg3[%c0_3, %c0_4, %c0_5] : memref<9x8x4xf32, #tpu.memory_space<vmem>>, vector<1x8x4xf32>
    %10 = vector.shape_cast %9 : vector<1x8x4xf32> to vector<8x4xf32>
    %cst_6 = arith.constant dense<0.000000e+00> : vector<8x128xf32>
    %11 = tpu.matmul %10, %8, %cst_6 {dimension_numbers = #tpu.dot_dimension_numbers<[1], [1], [0], [0], [0, 0, 1, 0], [], []>} : vector<8x4xf32>, vector<128x4xf32>, vector<8x128xf32> -> vector<8x128xf32>
    %12 = arith.addf %4, %11 : vector<8x128xf32>
    %c0_i32_7 = arith.constant 0 : i32
    %13 = arith.addi %3, %c0_i32_7 : i32
    %14 = arith.index_cast %13 : i32 to index
    %c2 = arith.constant 2 : index
    %c0_8 = arith.constant 0 : index
    %15 = vector.load %arg6[%14, %c2, %c0_8] : memref<20x20x4xf32, #tpu.memory_space<vmem>>, vector<8x16x4xf32>
    %16 = vector.shape_cast %15 : vector<8x16x4xf32> to vector<128x4xf32>
    %c1 = arith.constant 1 : index
    %c0_9 = arith.constant 0 : index
    %c0_10 = arith.constant 0 : index
    %17 = vector.load %arg3[%c1, %c0_9, %c0_10] : memref<9x8x4xf32, #tpu.memory_space<vmem>>, vector<1x8x4xf32>
    %18 = vector.shape_cast %17 : vector<1x8x4xf32> to vector<8x4xf32>
    %cst_11 = arith.constant dense<0.000000e+00> : vector<8x128xf32>
    %19 = tpu.matmul %18, %16, %cst_11 {dimension_numbers = #tpu.dot_dimension_numbers<[1], [1], [0], [0], [0, 0, 1, 0], [], []>} : vector<8x4xf32>, vector<128x4xf32>, vector<8x128xf32> -> vector<8x128xf32>
    %20 = arith.addf %12, %19 : vector<8x128xf32>
    %c0_i32_12 = arith.constant 0 : i32
    %21 = arith.addi %3, %c0_i32_12 : i32
    %22 = arith.index_cast %21 : i32 to index
    %c4 = arith.constant 4 : index
    %c0_13 = arith.constant 0 : index
    %23 = vector.load %arg6[%22, %c4, %c0_13] : memref<20x20x4xf32, #tpu.memory_space<vmem>>, vector<8x16x4xf32>
    %24 = vector.shape_cast %23 : vector<8x16x4xf32> to vector<128x4xf32>
    %c2_14 = arith.constant 2 : index
    %c0_15 = arith.constant 0 : index
    %c0_16 = arith.constant 0 : index
    %25 = vector.load %arg3[%c2_14, %c0_15, %c0_16] : memref<9x8x4xf32, #tpu.memory_space<vmem>>, vector<1x8x4xf32>
    %26 = vector.shape_cast %25 : vector<1x8x4xf32> to vector<8x4xf32>
    %cst_17 = arith.constant dense<0.000000e+00> : vector<8x128xf32>
    %27 = tpu.matmul %26, %24, %cst_17 {dimension_numbers = #tpu.dot_dimension_numbers<[1], [1], [0], [0], [0, 0, 1, 0], [], []>} : vector<8x4xf32>, vector<128x4xf32>, vector<8x128xf32> -> vector<8x128xf32>
    %28 = arith.addf %20, %27 : vector<8x128xf32>
    %c2_i32 = arith.constant 2 : i32
    %29 = arith.addi %3, %c2_i32 : i32
    %30 = arith.index_cast %29 : i32 to index
    %c0_18 = arith.constant 0 : index
    %c0_19 = arith.constant 0 : index
    %31 = vector.load %arg6[%30, %c0_18, %c0_19] : memref<20x20x4xf32, #tpu.memory_space<vmem>>, vector<8x16x4xf32>
    %32 = vector.shape_cast %31 : vector<8x16x4xf32> to vector<128x4xf32>
    %c3 = arith.constant 3 : index
    %c0_20 = arith.constant 0 : index
    %c0_21 = arith.constant 0 : index
    %33 = vector.load %arg3[%c3, %c0_20, %c0_21] : memref<9x8x4xf32, #tpu.memory_space<vmem>>, vector<1x8x4xf32>
    %34 = vector.shape_cast %33 : vector<1x8x4xf32> to vector<8x4xf32>
    %cst_22 = arith.constant dense<0.000000e+00> : vector<8x128xf32>
    %35 = tpu.matmul %34, %32, %cst_22 {dimension_numbers = #tpu.dot_dimension_numbers<[1], [1], [0], [0], [0, 0, 1, 0], [], []>} : vector<8x4xf32>, vector<128x4xf32>, vector<8x128xf32> -> vector<8x128xf32>
    %36 = arith.addf %28, %35 : vector<8x128xf32>
    %c2_i32_23 = arith.constant 2 : i32
    %37 = arith.addi %3, %c2_i32_23 : i32
    %38 = arith.index_cast %37 : i32 to index
    %c2_24 = arith.constant 2 : index
    %c0_25 = arith.constant 0 : index
    %39 = vector.load %arg6[%38, %c2_24, %c0_25] : memref<20x20x4xf32, #tpu.memory_space<vmem>>, vector<8x16x4xf32>
    %40 = vector.shape_cast %39 : vector<8x16x4xf32> to vector<128x4xf32>
    %c4_26 = arith.constant 4 : index
    %c0_27 = arith.constant 0 : index
    %c0_28 = arith.constant 0 : index
    %41 = vector.load %arg3[%c4_26, %c0_27, %c0_28] : memref<9x8x4xf32, #tpu.memory_space<vmem>>, vector<1x8x4xf32>
    %42 = vector.shape_cast %41 : vector<1x8x4xf32> to vector<8x4xf32>
    %cst_29 = arith.constant dense<0.000000e+00> : vector<8x128xf32>
    %43 = tpu.matmul %42, %40, %cst_29 {dimension_numbers = #tpu.dot_dimension_numbers<[1], [1], [0], [0], [0, 0, 1, 0], [], []>} : vector<8x4xf32>, vector<128x4xf32>, vector<8x128xf32> -> vector<8x128xf32>
    %44 = arith.addf %36, %43 : vector<8x128xf32>
    %c2_i32_30 = arith.constant 2 : i32
    %45 = arith.addi %3, %c2_i32_30 : i32
    %46 = arith.index_cast %45 : i32 to index
    %c4_31 = arith.constant 4 : index
    %c0_32 = arith.constant 0 : index
    %47 = vector.load %arg6[%46, %c4_31, %c0_32] : memref<20x20x4xf32, #tpu.memory_space<vmem>>, vector<8x16x4xf32>
    %48 = vector.shape_cast %47 : vector<8x16x4xf32> to vector<128x4xf32>
    %c5 = arith.constant 5 : index
    %c0_33 = arith.constant 0 : index
    %c0_34 = arith.constant 0 : index
    %49 = vector.load %arg3[%c5, %c0_33, %c0_34] : memref<9x8x4xf32, #tpu.memory_space<vmem>>, vector<1x8x4xf32>
    %50 = vector.shape_cast %49 : vector<1x8x4xf32> to vector<8x4xf32>
    %cst_35 = arith.constant dense<0.000000e+00> : vector<8x128xf32>
    %51 = tpu.matmul %50, %48, %cst_35 {dimension_numbers = #tpu.dot_dimension_numbers<[1], [1], [0], [0], [0, 0, 1, 0], [], []>} : vector<8x4xf32>, vector<128x4xf32>, vector<8x128xf32> -> vector<8x128xf32>
    %52 = arith.addf %44, %51 : vector<8x128xf32>
    %c4_i32 = arith.constant 4 : i32
    %53 = arith.addi %3, %c4_i32 : i32
    %54 = arith.index_cast %53 : i32 to index
    %c0_36 = arith.constant 0 : index
    %c0_37 = arith.constant 0 : index
    %55 = vector.load %arg6[%54, %c0_36, %c0_37] : memref<20x20x4xf32, #tpu.memory_space<vmem>>, vector<8x16x4xf32>
    %56 = vector.shape_cast %55 : vector<8x16x4xf32> to vector<128x4xf32>
    %c6 = arith.constant 6 : index
    %c0_38 = arith.constant 0 : index
    %c0_39 = arith.constant 0 : index
    %57 = vector.load %arg3[%c6, %c0_38, %c0_39] : memref<9x8x4xf32, #tpu.memory_space<vmem>>, vector<1x8x4xf32>
    %58 = vector.shape_cast %57 : vector<1x8x4xf32> to vector<8x4xf32>
    %cst_40 = arith.constant dense<0.000000e+00> : vector<8x128xf32>
    %59 = tpu.matmul %58, %56, %cst_40 {dimension_numbers = #tpu.dot_dimension_numbers<[1], [1], [0], [0], [0, 0, 1, 0], [], []>} : vector<8x4xf32>, vector<128x4xf32>, vector<8x128xf32> -> vector<8x128xf32>
    %60 = arith.addf %52, %59 : vector<8x128xf32>
    %c4_i32_41 = arith.constant 4 : i32
    %61 = arith.addi %3, %c4_i32_41 : i32
    %62 = arith.index_cast %61 : i32 to index
    %c2_42 = arith.constant 2 : index
    %c0_43 = arith.constant 0 : index
    %63 = vector.load %arg6[%62, %c2_42, %c0_43] : memref<20x20x4xf32, #tpu.memory_space<vmem>>, vector<8x16x4xf32>
    %64 = vector.shape_cast %63 : vector<8x16x4xf32> to vector<128x4xf32>
    %c7 = arith.constant 7 : index
    %c0_44 = arith.constant 0 : index
    %c0_45 = arith.constant 0 : index
    %65 = vector.load %arg3[%c7, %c0_44, %c0_45] : memref<9x8x4xf32, #tpu.memory_space<vmem>>, vector<1x8x4xf32>
    %66 = vector.shape_cast %65 : vector<1x8x4xf32> to vector<8x4xf32>
    %cst_46 = arith.constant dense<0.000000e+00> : vector<8x128xf32>
    %67 = tpu.matmul %66, %64, %cst_46 {dimension_numbers = #tpu.dot_dimension_numbers<[1], [1], [0], [0], [0, 0, 1, 0], [], []>} : vector<8x4xf32>, vector<128x4xf32>, vector<8x128xf32> -> vector<8x128xf32>
    %68 = arith.addf %60, %67 : vector<8x128xf32>
    %c4_i32_47 = arith.constant 4 : i32
    %69 = arith.addi %3, %c4_i32_47 : i32
    %70 = arith.index_cast %69 : i32 to index
    %c4_48 = arith.constant 4 : index
    %c0_49 = arith.constant 0 : index
    %71 = vector.load %arg6[%70, %c4_48, %c0_49] : memref<20x20x4xf32, #tpu.memory_space<vmem>>, vector<8x16x4xf32>
    %72 = vector.shape_cast %71 : vector<8x16x4xf32> to vector<128x4xf32>
    %c8 = arith.constant 8 : index
    %c0_50 = arith.constant 0 : index
    %c0_51 = arith.constant 0 : index
    %73 = vector.load %arg3[%c8, %c0_50, %c0_51] : memref<9x8x4xf32, #tpu.memory_space<vmem>>, vector<1x8x4xf32>
    %74 = vector.shape_cast %73 : vector<1x8x4xf32> to vector<8x4xf32>
    %cst_52 = arith.constant dense<0.000000e+00> : vector<8x128xf32>
    %75 = tpu.matmul %74, %72, %cst_52 {dimension_numbers = #tpu.dot_dimension_numbers<[1], [1], [0], [0], [0, 0, 1, 0], [], []>} : vector<8x4xf32>, vector<128x4xf32>, vector<8x128xf32> -> vector<8x128xf32>
    %76 = arith.addf %68, %75 : vector<8x128xf32>
    %c0_53 = arith.constant 0 : index
    %c0_54 = arith.constant 0 : index
    %77 = vector.load %arg4[%c0_53, %c0_54] : memref<8x1xf32, #tpu.memory_space<vmem>>, vector<8x1xf32>
    %78 = vector.broadcast %77 : vector<8x1xf32> to vector<8x128xf32>
    %79 = arith.addf %76, %78 : vector<8x128xf32>
    %c0_55 = arith.constant 0 : index
    %c0_56 = arith.constant 0 : index
    %c0_57 = arith.constant 0 : index
    %80 = vector.load %arg5[%c0_55, %c0_56, %c0_57] : memref<1x8x128xf32, #tpu.memory_space<vmem>>, vector<1x8x128xf32>
    %81 = vector.shape_cast %80 : vector<1x8x128xf32> to vector<8x128xf32>
    %82 = vector.shape_cast %79 : vector<8x128xf32> to vector<1x8x128xf32>
    tpu.vector_store %arg5[%c0_55, %c0_56, %c0_57], %82 {strides = array<i32>} : memref<1x8x128xf32, #tpu.memory_space<vmem>>, vector<1x8x128xf32>,
    return
  }
  func.func @transform_0(%arg0: i32, %arg1: i32) -> (i32, i32, i32, i32) {
    %c0_i32 = arith.constant 0 : i32
    %c0_i32_0 = arith.constant 0 : i32
    %c0_i32_1 = arith.constant 0 : i32
    %c0_i32_2 = arith.constant 0 : i32
    return %arg0, %c0_i32, %c0_i32_0, %c0_i32_1 : i32, i32, i32, i32
  }
  func.func @transform_1(%arg0: i32, %arg1: i32) -> (i32, i32, i32) {
    %c0_i32 = arith.constant 0 : i32
    %c0_i32_0 = arith.constant 0 : i32
    %c0_i32_1 = arith.constant 0 : i32
    %c0_i32_2 = arith.constant 0 : i32
    return %c0_i32, %c0_i32_0, %c0_i32_1 : i32, i32, i32
  }
  func.func @transform_2(%arg0: i32, %arg1: i32) -> (i32, i32) {
    %c0_i32 = arith.constant 0 : i32
    %c0_i32_0 = arith.constant 0 : i32
    %c0_i32_1 = arith.constant 0 : i32
    return %c0_i32, %c0_i32_0 : i32, i32
  }
  func.func @transform_3(%arg0: i32, %arg1: i32) -> (i32, i32, i32) {
    %c0_i32 = arith.constant 0 : i32
    %c0_i32_0 = arith.constant 0 : i32
    return %arg0, %c0_i32, %arg1 : i32, i32, i32
  }
}

</mosaic_0001>

<bundles_post_ra>
// kernel: tpu_custom_call.1
= control target key start
LH: loop header
LB: loop body
LE: loop exit
PB: predicated region body
PF: predicated region fallthrough
CT: control target
= control target key end

     0   :  { %8 = vsyncpa [#allocation4], 0  ;;  %s3676_s0 = inlined_call_operand.vmem [shape: f32[2,16,16,4], index: 0, kind: input, shape index: {}]   ;;  %s3677_s1 = inlined_call_operand.vmem [shape: f32[9,8,4], index: 1, kind: input, shape index: {}]   ;;  %s3678_s2 = inlined_call_operand.vmem [shape: f32[8,1], index: 2, kind: input, shape index: {}]   ;;  %s3679_s3 = inlined_call_operand.hbm [shape: f32[2,8,256], index: 3, kind: output, shape index: {}]  }
   0x1   :  { %10 = vsyncpa [#allocation4 + $0x1], 0  ;;  %s2952_s12 = smov 0   ;;  %s2954_s13 = smov 0  }
   0x2   :  { %s2956_s14 = smov 0   ;;  %s2958_s15 = smov 0  }
   0x3   :  { %s2960_s16 = smov 0   ;;  %s2962_s17 = smov 0  }
   0x4   :  { %s2964_s18 = smov 0   ;;  %s2966_s19 = smov 0  }
   0x5 LB: > { %s1719_s20 = sadd.s32 4294967295, %s2924_s19   ;;  %s1720_s21 = sadd.s32 4294967294, %s2924_s19   ;;  %s2924_s19 = sphi %s2966_s19, %s16_s19   ;;  %s2920_s18 = sphi %s2964_s18, %s3690_s18   ;;  %s2916_s17 = sphi %s2962_s17, %s3689_s17   ;;  %s2912_s16 = sphi %s2960_s16, %s3688_s16   ;;  %s2908_s15 = sphi %s2958_s15, %s3687_s15   ;;  %s2904_s14 = sphi %s2956_s14, %s3686_s14   ;;  %s2900_s13 = sphi %s2954_s13, %s3685_s13   ;;  %s2896_s12 = sphi %s2952_s12, %s3684_s12  }
   0x6   : > { %s25_s22 = sadd.s32 1, %s2916_s17  ;;  %s28_s23 = sadd.s32 1, %s2920_s18 }
   0x7   : > { %p26_p0 = scmp.ge.s32.totalorder %s25_s22, 2  ;;  %p115_p1 = scmp.ne.s32.totalorder %s2904_s14, %s2900_s13 }
   0x8   : > { %p116_p2 = scmp.eq.s32.totalorder %s1719_s20, 3  ;;  %p121_p5 = scmp.ne.s32.totalorder %s2900_s13, %s2896_s12 }
   0x9   : > { %s3692_s22 = smov (%p26_p0, %s25_s22), 0  ;;  %s3694_s23 = smov (!%p26_p0, %s28_s23), %s2920_s18 }
   0xa   : > { %s101_s24 = ssub.s32 %s2916_s17, %s3692_s22  ;;  %p3003_p3 = por %p116_p2, %p115_p1 }
   0xb   : > { %p30_p4 = scmp.ge.s32.totalorder %s3694_s23, 2  ;;  %p122_p6 = scmp.eq.s32.totalorder %s1720_s21, 3 }
   0xc   : > { %p1723_p7 = scmp.ge.s32.totalorder %s2924_s19, 1  ;;  %p154_p9 = scmp.lt.s32.totalorder %s2924_s19, 5 }
   0xd   : > { %s3696_s23 = smov (%p30_p4, %s3694_s23), 0  ;;  %p3012_p8 = por %p122_p6, %p121_p5 }
   0xe   : > { %s100_s27 = ssub.s32 %s2920_s18, %s3696_s23  ;;  %s105_s28 = sadd.s32 1, %s2904_s14 }
   0xf   : > { %s102_s29 = sor.u32 %s101_s24, %s100_s27  ;;  %p155_p10 = pnand %p1723_p7, %p154_p9 }
  0x10   : > { %p103_p11 = scmp.eq.s32.totalorder %s102_s29, 0  ;;  %s175_s4 = sand.u32 (!%p155_p10), 1, %s2900_s13  }
  0x11   : > { %158 = sbr.rel (%p155_p10) target bundleno = 631 (0x277), region = 32  ;;  %p178_p12 = scmp.lt.s32.totalorder (!%p155_p10), %s2912_s16, 1 }
  0x12   : > { %s3021_s30 = scalar_select %p103_p11, %s2904_s14, %s105_s28  }
  0x13   : > { %s3027_s5 = sshll.u32 (!%p155_p10), %s175_s4, 3  ;;  %p1727_p13 = scmp.ne.s32.totalorder (!%p155_p10), %s2908_s15, 0 }
  0x14   : > { %s177_s11 = scalar_lea.vmem (!%p155_p10), [#allocation3], %s3027_s5 }
  0x18   : > { %s179_s6 = scalar_select %p178_p12, %s2912_s16, 1 }
  0x19   : > { %186 = sbr.rel (%p1727_p13) target bundleno = 73 (0x49), region = 36  ;;  %vm187_vm0 = vcmask (!%p1727_p13), 31744   ;;  %vm190_vm1 = vcmask (!%p1727_p13), 27648   ;;  %v2926_v3 = vmov (!%p1727_p13), 0.0  }
  0x1a   : > { %s1996_s7 = sshll.u32 %s179_s6, 8  ;;  %195 = vst.msk [vmem:[#allocation2 + $0x30] sm:$0xff] (!%p1727_p13), %vm187_vm0, %v2926_v3  ;;  %188 = vst.msk [vmem:[#allocation2] sm:$0xff] (!%p1727_p13), %vm187_vm0, %v2926_v3 }
  0x1b   : > { %s3033_s10 = scalar_lea.vmem %s3676_s0, %s1996_s7  ;;  %189 = vst.msk [vmem:[#allocation2 + $0x8] sm:$0xff] (!%p1727_p13), %vm187_vm0, %v2926_v3  ;;  %192 = vst.msk [vmem:[#allocation2 + $0x18] sm:$0xff] (!%p1727_p13), %vm187_vm0, %v2926_v3 }
  0x1c   : > { %v3038_v0 = vld [vmem:[%s3033_s10] sm:$0xff] (!%p1727_p13)  ;;  %v3041_v1 = vld [vmem:[%s3033_s10 + $0x8] sm:$0xff] (!%p1727_p13)  ;;  %v3044_v2 = vld [vmem:[%s3033_s10 + $0x10] sm:$0xff] (!%p1727_p13)  ;;  %193 = vst.msk [vmem:[#allocation2 + $0x20] sm:$0xff] (!%p1727_p13), %vm187_vm0, %v2926_v3 }
  0x1d   : > { %196 = vst.msk [vmem:[#allocation2 + $0x38] sm:$0xff] (!%p1727_p13), %vm187_vm0, %v2926_v3  ;;  %198 = vst.msk [vmem:[#allocation2 + $0x48] sm:$0xff] (!%p1727_p13), %vm187_vm0, %v2926_v3  ;;  %v281_v4 = vmax.f32 (!%p1727_p13), %v3038_v0, 0.0  ;;  %v282_v5 = vmax.f32 (!%p1727_p13), %v3041_v1, 0.0  ;;  %v283_v6 = vmax.f32 (!%p1727_p13), %v3044_v2, 0.0  ;;  %v252_v7 = vld [vmem:[%s3033_s10 + $0x18] sm:$0xff] (!%p1727_p13) }
  0x1e   : > { %199 = vst.msk [vmem:[#allocation2 + $0x50] sm:$0xff] (!%p1727_p13), %vm187_vm0, %v2926_v3  ;;  %201 = vst.msk [vmem:[#allocation2 + $0x60] sm:$0xff] (!%p1727_p13), %vm187_vm0, %v2926_v3  ;;  %v253_v8 = vld [vmem:[%s3033_s10 + $0x20] sm:$0xff] (!%p1727_p13)  ;;  %v254_v9 = vld [vmem:[%s3033_s10 + $0x28] sm:$0xff] (!%p1727_p13)  ;;  %v284_v10 = vmax.f32 (!%p1727_p13), %v252_v7, 0.0 }
  0x1f   : > { %202 = vst.msk [vmem:[#allocation2 + $0x68] sm:$0xff] (!%p1727_p13), %vm187_vm0, %v2926_v3  ;;  %204 = vst.msk [vmem:[#allocation2 + $0x78] sm:$0xff] (!%p1727_p13), %vm187_vm0, %v2926_v3  ;;  %v285_v11 = vmax.f32 (!%p1727_p13), %v253_v8, 0.0  ;;  %v286_v12 = vmax.f32 (!%p1727_p13), %v254_v9, 0.0  ;;  %v255_v13 = vld [vmem:[%s3033_s10 + $0x30] sm:$0xff] (!%p1727_p13)  ;;  %v256_v14 = vld [vmem:[%s3033_s10 + $0x38] sm:$0xff] (!%p1727_p13) }
  0x20   : > { %205 = vst.msk [vmem:[#allocation2 + $0x80] sm:$0xff] %vm187_vm0, %v2926_v3  ;;  %207 = vst.msk [vmem:[#allocation2 + $0x90] sm:$0xff] %vm187_vm0, %v2926_v3  ;;  %v257_v15 = vld [vmem:[%s3033_s10 + $0x40] sm:$0xff]  ;;  %v287_v16 = vmax.f32 %v255_v13, 0.0  ;;  %v288_v17 = vmax.f32 %v256_v14, 0.0  ;;  %v258_v19 = vld [vmem:[%s3033_s10 + $0x48] sm:$0xff] }
  0x21   : > { %208 = vst.msk [vmem:[#allocation2 + $0x98] sm:$0xff] %vm187_vm0, %v2926_v3  ;;  %210 = vst.msk [vmem:[#allocation2 + $0xa8] sm:$0xff] %vm187_vm0, %v2926_v3  ;;  %v289_v18 = vmax.f32 %v257_v15, 0.0  ;;  %v259_v20 = vld [vmem:[%s3033_s10 + $0x50] sm:$0xff]  ;;  %v260_v21 = vld [vmem:[%s3033_s10 + $0x58] sm:$0xff]  ;;  %v290_v22 = vmax.f32 %v258_v19, 0.0 }
  0x22   : > { %211 = vst.msk [vmem:[#allocation2 + $0xb0] sm:$0xff] %vm187_vm0, %v2926_v3  ;;  %213 = vst.msk [vmem:[#allocation2 + $0xc0] sm:$0xff] %vm187_vm0, %v2926_v3  ;;  %v291_v23 = vmax.f32 %v259_v20, 0.0  ;;  %v292_v24 = vmax.f32 %v260_v21, 0.0  ;;  %v261_v25 = vld [vmem:[%s3033_s10 + $0x60] sm:$0xff]  ;;  %v262_v26 = vld [vmem:[%s3033_s10 + $0x68] sm:$0xff] }
  0x23   : > { %214 = vst.msk [vmem:[#allocation2 + $0xc8] sm:$0xff] %vm187_vm0, %v2926_v3  ;;  %216 = vst.msk [vmem:[#allocation2 + $0xd8] sm:$0xff] %vm187_vm0, %v2926_v3  ;;  %v263_v27 = vld [vmem:[%s3033_s10 + $0x70] sm:$0xff]  ;;  %v293_v28 = vmax.f32 %v261_v25, 0.0  ;;  %v294_v29 = vmax.f32 %v262_v26, 0.0  ;;  %v264_v31 = vld [vmem:[%s3033_s10 + $0x78] sm:$0xff] }
  0x24   : > { %217 = vst.msk [vmem:[#allocation2 + $0xe0] sm:$0xff] %vm187_vm0, %v2926_v3  ;;  %219 = vst.msk [vmem:[#allocation2 + $0xf0] sm:$0xff] %vm187_vm0, %v2926_v3  ;;  %v295_v30 = vmax.f32 %v263_v27, 0.0  ;;  %v265_v32 = vld [vmem:[%s3033_s10 + $0x80] sm:$0xff]  ;;  %v266_v33 = vld [vmem:[%s3033_s10 + $0x88] sm:$0xff]  ;;  %v296_v34 = vmax.f32 %v264_v31, 0.0 }
  0x25   : > { %220 = vst.msk [vmem:[#allocation2 + $0xf8] sm:$0xff] %vm187_vm0, %v2926_v3  ;;  %222 = vst.msk [vmem:[#allocation2 + $0x108] sm:$0xff] %vm187_vm0, %v2926_v3  ;;  %v297_v35 = vmax.f32 %v265_v32, 0.0  ;;  %v298_v36 = vmax.f32 %v266_v33, 0.0  ;;  %v267_v37 = vld [vmem:[%s3033_s10 + $0x90] sm:$0xff]  ;;  %v268_v38 = vld [vmem:[%s3033_s10 + $0x98] sm:$0xff] }
  0x26   : > { %223 = vst.msk [vmem:[#allocation2 + $0x110] sm:$0xff] %vm187_vm0, %v2926_v3  ;;  %225 = vst.msk [vmem:[#allocation2 + $0x120] sm:$0xff] %vm187_vm0, %v2926_v3  ;;  %v269_v39 = vld [vmem:[%s3033_s10 + $0xa0] sm:$0xff]  ;;  %v299_v40 = vmax.f32 %v267_v37, 0.0  ;;  %v300_v41 = vmax.f32 %v268_v38, 0.0  ;;  %v270_v43 = vld [vmem:[%s3033_s10 + $0xa8] sm:$0xff] }
  0x27   : > { %226 = vst.msk [vmem:[#allocation2 + $0x128] sm:$0xff] %vm187_vm0, %v2926_v3  ;;  %228 = vst.msk [vmem:[#allocation2 + $0x138] sm:$0xff] %vm187_vm0, %v2926_v3  ;;  %v301_v42 = vmax.f32 %v269_v39, 0.0  ;;  %v271_v44 = vld [vmem:[%s3033_s10 + $0xb0] sm:$0xff]  ;;  %v272_v45 = vld [vmem:[%s3033_s10 + $0xb8] sm:$0xff]  ;;  %v302_v46 = vmax.f32 %v270_v43, 0.0 }
  0x28   : > { %229 = vst.msk [vmem:[#allocation2 + $0x140] sm:$0xff] %vm187_vm0, %v2926_v3  ;;  %231 = vst.msk [vmem:[#allocation2 + $0x150] sm:$0xff] %vm187_vm0, %v2926_v3  ;;  %v303_v47 = vmax.f32 %v271_v44, 0.0  ;;  %v304_v48 = vmax.f32 %v272_v45, 0.0  ;;  %v273_v49 = vld [vmem:[%s3033_s10 + $0xc0] sm:$0xff]  ;;  %v274_v50 = vld [vmem:[%s3033_s10 + $0xc8] sm:$0xff] }
  0x29   : > { %232 = vst.msk [vmem:[#allocation2 + $0x158] sm:$0xff] %vm187_vm0, %v2926_v3  ;;  %234 = vst.msk [vmem:[#allocation2 + $0x168] sm:$0xff] %vm187_vm0, %v2926_v3  ;;  %v275_v51 = vld [vmem:[%s3033_s10 + $0xd0] sm:$0xff]  ;;  %v305_v52 = vmax.f32 %v273_v49, 0.0  ;;  %v306_v53 = vmax.f32 %v274_v50, 0.0  ;;  %v276_v55 = vld [vmem:[%s3033_s10 + $0xd8] sm:$0xff] }
  0x2a   : > { %235 = vst.msk [vmem:[#allocation2 + $0x170] sm:$0xff] %vm187_vm0, %v2926_v3  ;;  %237 = vst.msk [vmem:[#allocation2 + $0x180] sm:$0xff] %vm187_vm0, %v2926_v3  ;;  %v307_v54 = vmax.f32 %v275_v51, 0.0  ;;  %v277_v56 = vld [vmem:[%s3033_s10 + $0xe0] sm:$0xff]  ;;  %v278_v57 = vld [vmem:[%s3033_s10 + $0xe8] sm:$0xff]  ;;  %v308_v58 = vmax.f32 %v276_v55, 0.0 }
  0x2b   : > { %238 = vst.msk [vmem:[#allocation2 + $0x188] sm:$0xff] %vm187_vm0, %v2926_v3  ;;  %240 = vst.msk [vmem:[#allocation2 + $0x198] sm:$0xff] %vm187_vm0, %v2926_v3  ;;  %v309_v59 = vmax.f32 %v277_v56, 0.0  ;;  %v310_v60 = vmax.f32 %v278_v57, 0.0  ;;  %v279_v61 = vld [vmem:[%s3033_s10 + $0xf0] sm:$0xff]  ;;  %v280_v62 = vld [vmem:[%s3033_s10 + $0xf8] sm:$0xff] }
  0x2c   : > { %241 = vst.msk [vmem:[#allocation2 + $0x1a0] sm:$0xff] %vm187_vm0, %v2926_v3  ;;  %243 = vst.msk [vmem:[#allocation2 + $0x1b0] sm:$0xff] %vm187_vm0, %v2926_v3  ;;  %v311_v63 = vmax.f32 %v279_v61, 0.0  ;;  %v312_v0 = vmax.f32 %v280_v62, 0.0 }
  0x2d   : > { %244 = vst.msk [vmem:[#allocation2 + $0x1b8] sm:$0xff] %vm187_vm0, %v2926_v3  ;;  %246 = vst.msk [vmem:[#allocation2 + $0x1c8] sm:$0xff] %vm187_vm0, %v2926_v3 }
  0x2e   : > { %247 = vst.msk [vmem:[#allocation2 + $0x1d0] sm:$0xff] %vm187_vm0, %v2926_v3  ;;  %314 = vst.msk [vmem:[#allocation2 + $0x32] sm:$0xff] %vm187_vm0, %v281_v4 }
  0x2f   : > { %197 = vst.msk [vmem:[#allocation2 + $0x40] sm:$0xf] %vm190_vm1, %v2926_v3  ;;  %191 = vst.msk [vmem:[#allocation2 + $0x10] sm:$0xf] %vm190_vm1, %v2926_v3 }
  0x30   : > { %194 = vst.msk [vmem:[#allocation2 + $0x28] sm:$0xf] %vm190_vm1, %v2926_v3  ;;  %200 = vst.msk [vmem:[#allocation2 + $0x58] sm:$0xf] %vm190_vm1, %v2926_v3 }
  0x31   : > { %203 = vst.msk [vmem:[#allocation2 + $0x70] sm:$0xf] %vm190_vm1, %v2926_v3  ;;  %206 = vst.msk [vmem:[#allocation2 + $0x88] sm:$0xf] %vm190_vm1, %v2926_v3 }
  0x32   : > { %209 = vst.msk [vmem:[#allocation2 + $0xa0] sm:$0xf] %vm190_vm1, %v2926_v3  ;;  %212 = vst.msk [vmem:[#allocation2 + $0xb8] sm:$0xf] %vm190_vm1, %v2926_v3 }
  0x33   : > { %215 = vst.msk [vmem:[#allocation2 + $0xd0] sm:$0xf] %vm190_vm1, %v2926_v3  ;;  %218 = vst.msk [vmem:[#allocation2 + $0xe8] sm:$0xf] %vm190_vm1, %v2926_v3 }
  0x34   : > { %221 = vst.msk [vmem:[#allocation2 + $0x100] sm:$0xf] %vm190_vm1, %v2926_v3  ;;  %224 = vst.msk [vmem:[#allocation2 + $0x118] sm:$0xf] %vm190_vm1, %v2926_v3 }
  0x35   : > { %227 = vst.msk [vmem:[#allocation2 + $0x130] sm:$0xf] %vm190_vm1, %v2926_v3  ;;  %230 = vst.msk [vmem:[#allocation2 + $0x148] sm:$0xf] %vm190_vm1, %v2926_v3 }
  0x36   : > { %233 = vst.msk [vmem:[#allocation2 + $0x160] sm:$0xf] %vm190_vm1, %v2926_v3  ;;  %236 = vst.msk [vmem:[#allocation2 + $0x178] sm:$0xf] %vm190_vm1, %v2926_v3 }
  0x37   : > { %239 = vst.msk [vmem:[#allocation2 + $0x190] sm:$0xf] %vm190_vm1, %v2926_v3  ;;  %242 = vst.msk [vmem:[#allocation2 + $0x1a8] sm:$0xf] %vm190_vm1, %v2926_v3 }
  0x38   : > { %245 = vst.msk [vmem:[#allocation2 + $0x1c0] sm:$0xf] %vm190_vm1, %v2926_v3  ;;  %248 = vst.msk [vmem:[#allocation2 + $0x1d8] sm:$0xf] %vm190_vm1, %v2926_v3 }
  0x39   : > { %315 = vst.msk [vmem:[#allocation2 + $0x3a] sm:$0xff] %vm187_vm0, %v282_v5  ;;  %316 = vst.msk [vmem:[#allocation2 + $0x4a] sm:$0xff] %vm187_vm0, %v283_v6 }
  0x3a   : > { %317 = vst.msk [vmem:[#allocation2 + $0x52] sm:$0xff] %vm187_vm0, %v284_v10  ;;  %318 = vst.msk [vmem:[#allocation2 + $0x62] sm:$0xff] %vm187_vm0, %v285_v11 }
  0x3b   : > { %319 = vst.msk [vmem:[#allocation2 + $0x6a] sm:$0xff] %vm187_vm0, %v286_v12  ;;  %320 = vst.msk [vmem:[#allocation2 + $0x7a] sm:$0xff] %vm187_vm0, %v287_v16 }
  0x3c   : > { %321 = vst.msk [vmem:[#allocation2 + $0x82] sm:$0xff] %vm187_vm0, %v288_v17  ;;  %322 = vst.msk [vmem:[#allocation2 + $0x92] sm:$0xff] %vm187_vm0, %v289_v18 }
  0x3d   : > { %323 = vst.msk [vmem:[#allocation2 + $0x9a] sm:$0xff] %vm187_vm0, %v290_v22  ;;  %324 = vst.msk [vmem:[#allocation2 + $0xaa] sm:$0xff] %vm187_vm0, %v291_v23 }
  0x3e   : > { %325 = vst.msk [vmem:[#allocation2 + $0xb2] sm:$0xff] %vm187_vm0, %v292_v24  ;;  %326 = vst.msk [vmem:[#allocation2 + $0xc2] sm:$0xff] %vm187_vm0, %v293_v28 }
  0x3f   : > { %327 = vst.msk [vmem:[#allocation2 + $0xca] sm:$0xff] %vm187_vm0, %v294_v29  ;;  %328 = vst.msk [vmem:[#allocation2 + $0xda] sm:$0xff] %vm187_vm0, %v295_v30 }
  0x40   : > { %329 = vst.msk [vmem:[#allocation2 + $0xe2] sm:$0xff] %vm187_vm0, %v296_v34  ;;  %330 = vst.msk [vmem:[#allocation2 + $0xf2] sm:$0xff] %vm187_vm0, %v297_v35 }
  0x41   : > { %331 = vst.msk [vmem:[#allocation2 + $0xfa] sm:$0xff] %vm187_vm0, %v298_v36  ;;  %332 = vst.msk [vmem:[#allocation2 + $0x10a] sm:$0xff] %vm187_vm0, %v299_v40 }
  0x42   : > { %333 = vst.msk [vmem:[#allocation2 + $0x112] sm:$0xff] %vm187_vm0, %v300_v41  ;;  %334 = vst.msk [vmem:[#allocation2 + $0x122] sm:$0xff] %vm187_vm0, %v301_v42 }
  0x43   : > { %335 = vst.msk [vmem:[#allocation2 + $0x12a] sm:$0xff] %vm187_vm0, %v302_v46  ;;  %336 = vst.msk [vmem:[#allocation2 + $0x13a] sm:$0xff] %vm187_vm0, %v303_v47 }
  0x44   : > { %337 = vst.msk [vmem:[#allocation2 + $0x142] sm:$0xff] %vm187_vm0, %v304_v48  ;;  %338 = vst.msk [vmem:[#allocation2 + $0x152] sm:$0xff] %vm187_vm0, %v305_v52 }
  0x45   : > { %339 = vst.msk [vmem:[#allocation2 + $0x15a] sm:$0xff] %vm187_vm0, %v306_v53  ;;  %340 = vst.msk [vmem:[#allocation2 + $0x16a] sm:$0xff] %vm187_vm0, %v307_v54 }
  0x46   : > { %341 = vst.msk [vmem:[#allocation2 + $0x172] sm:$0xff] %vm187_vm0, %v308_v58  ;;  %342 = vst.msk [vmem:[#allocation2 + $0x182] sm:$0xff] %vm187_vm0, %v309_v59 }
  0x47   : > { %343 = vst.msk [vmem:[#allocation2 + $0x18a] sm:$0xff] %vm187_vm0, %v310_v60  ;;  %344 = vst.msk [vmem:[#allocation2 + $0x19a] sm:$0xff] %vm187_vm0, %v311_v63 }
  0x48   : > { %345 = vst.msk [vmem:[#allocation2 + $0x1a2] sm:$0xff] %vm187_vm0, %v312_v0 }
  0x49 PF: > { %s1729_s20 = smul.u32 192, %s2908_s15  ;;  %vm384_vm2 = vcmask 31744   ;;  %v2927_v1 = vmov 0.0|0.0   ;;  %vm2928_vm4 = vmmov 0   ;;  %v2929_v3 = vmov 0.0   ;;  %v1730_v54 = vld [vmem:[%s3677_s1 + $0x8] sm:$0xff] }
  0x4a   : > { %2465 = vmatprep.subr.bf16.mxu0 %v2927_v1  ;;  %2497 = vmatprep.subr.bf16.mxu1 %v2927_v1  ;;  %vm3175_vm3 = vmpackc.low %vm384_vm2, %vm384_vm2  ;;  %v365_v56 = vld [vmem:[%s3677_s1] sm:$0xff]  ;;  %s1637_s28 = sshll.u32 %s177_s11, 4  ;;  %s2931_s8 = smov [#allocation3]   ;;  %s3621_s28 = int_to_ptr.vmem [resolvable:$true] %s1637_s28 }
  0x4b   : > { %2182 = vmatprep.mubr.msk.f32.mxu0 %vm2928_vm4, %v2929_v3  ;;  %2217 = vmatprep.mubr.msk.f32.mxu1 %vm2928_vm4, %v2929_v3  ;;  %s3183_s21 = scalar_lea.vmem [#allocation2], %s1729_s20  ;;  %s2834_s9 = sshll.u32 %s2931_s8, 4  ;;  %s2835_s9 = int_to_ptr.vmem [resolvable:$false] %s2834_s9 }
  0x4c   : > { %s2836_s10 = scalar_lea.vmem %s2835_s9, 256  ;;  %p2837_p4 = scmp.lt.s32.totalorder %s3621_s28, %s2835_s9 }
  0x4f   : > { %v366_v4 = vld [vmem:[%s3183_s21 + $0x2] sm:$0xff]  ;;  %v367_v5 = vld [vmem:[%s3183_s21 + $0xa] sm:$0xff]  ;;  %v368_v10 = vld [vmem:[%s3183_s21 + $0x1a] sm:$0xff] }
  0x50   : > { %v349_v6 = vld [vmem:[%s3183_s21] sm:$0xff]  ;;  %v2466_v7 = vpack.c.bf16 %v367_v5, %v366_v4  ;;  %v350_v8 = vld [vmem:[%s3183_s21 + $0x8] sm:$0xff]  ;;  %v351_v12 = vld [vmem:[%s3183_s21 + $0x18] sm:$0xff] }
  0x51   : > { %v2498_v9 = vpack.c.bf16 %v350_v8, %v349_v6  ;;  %v369_v11 = vld [vmem:[%s3183_s21 + $0x22] sm:$0xff]  ;;  %v370_v16 = vld [vmem:[%s3183_s21 + $0x32] sm:$0xff]  ;;  %v371_v17 = vld [vmem:[%s3183_s21 + $0x3a] sm:$0xff] }
  0x52   : > { %2468 = vmatpush3.bf16.xpose.msk.msra.mxu0 %vm3175_vm3, %v2466_v7  ;;  %v352_v13 = vld [vmem:[%s3183_s21 + $0x20] sm:$0xff]  ;;  %v2470_v14 = vpack.c.bf16 %v369_v11, %v368_v10  ;;  %v353_v18 = vld [vmem:[%s3183_s21 + $0x30] sm:$0xff]  ;;  %v354_v19 = vld [vmem:[%s3183_s21 + $0x38] sm:$0xff]  ;;  %v3209_v20 = vpack.c.bf16 %v371_v17, %v370_v16 }
  0x53   : > { %2500 = vmatpush3.bf16.xpose.msk.msra.mxu1 %vm3175_vm3, %v2498_v9  ;;  %2469 = vmatprep.subr.bf16.mxu0 %v2927_v1  ;;  %v2502_v15 = vpack.c.bf16 %v352_v13, %v351_v12  ;;  %v3211_v21 = vpack.c.bf16 %v354_v19, %v353_v18  ;;  %v372_v22 = vld [vmem:[%s3183_s21 + $0x4a] sm:$0xff]  ;;  %v373_v23 = vld [vmem:[%s3183_s21 + $0x52] sm:$0xff]  ;;  %v374_v28 = vld [vmem:[%s3183_s21 + $0x62] sm:$0xff] }
  0x54   : > { %2501 = vmatprep.subr.bf16.mxu1 %v2927_v1  ;;  %v355_v24 = vld [vmem:[%s3183_s21 + $0x48] sm:$0xff]  ;;  %v356_v25 = vld [vmem:[%s3183_s21 + $0x50] sm:$0xff]  ;;  %v3225_v26 = vpack.c.bf16 %v373_v23, %v372_v22  ;;  %v357_v30 = vld [vmem:[%s3183_s21 + $0x60] sm:$0xff] }
  0x55   : > { %v2510_v27 = vpack.c.bf16 %v356_v25, %v355_v24  ;;  %v375_v29 = vld [vmem:[%s3183_s21 + $0x6a] sm:$0xff]  ;;  %v376_v34 = vld [vmem:[%s3183_s21 + $0x7a] sm:$0xff]  ;;  %v377_v35 = vld [vmem:[%s3183_s21 + $0x82] sm:$0xff] }
  0x56   : > { %v358_v31 = vld [vmem:[%s3183_s21 + $0x68] sm:$0xff]  ;;  %v3238_v32 = vpack.c.bf16 %v375_v29, %v374_v28  ;;  %v359_v36 = vld [vmem:[%s3183_s21 + $0x78] sm:$0xff]  ;;  %v360_v37 = vld [vmem:[%s3183_s21 + $0x80] sm:$0xff]  ;;  %v3254_v38 = vpack.c.bf16 %v377_v35, %v376_v34 }
  0x57   : > { %v3240_v33 = vpack.c.bf16 %v358_v31, %v357_v30  ;;  %v3256_v39 = vpack.c.bf16 %v360_v37, %v359_v36  ;;  %v378_v40 = vld [vmem:[%s3183_s21 + $0x92] sm:$0xff]  ;;  %v379_v41 = vld [vmem:[%s3183_s21 + $0x9a] sm:$0xff]  ;;  %v380_v46 = vld [vmem:[%s3183_s21 + $0xaa] sm:$0xff] }
  0x58   : > { %v361_v42 = vld [vmem:[%s3183_s21 + $0x90] sm:$0xff]  ;;  %v362_v43 = vld [vmem:[%s3183_s21 + $0x98] sm:$0xff]  ;;  %v3270_v44 = vpack.c.bf16 %v379_v41, %v378_v40  ;;  %v363_v48 = vld [vmem:[%s3183_s21 + $0xa8] sm:$0xff] }
  0x59   : > { %v3272_v45 = vpack.c.bf16 %v362_v43, %v361_v42  ;;  %v381_v47 = vld [vmem:[%s3183_s21 + $0xb2] sm:$0xff]  ;;  %v627_v52 = vld [vmem:[%s3183_s21 + $0x4] sm:$0xff]  ;;  %v629_v57 = vld [vmem:[%s3183_s21 + $0x1c] sm:$0xff] }
  0x5a   : > { %2472 = vmatpush3.bf16.xpose.msk.msra.mxu0 %vm3175_vm3, %v2470_v14  ;;  %v364_v49 = vld [vmem:[%s3183_s21 + $0xb0] sm:$0xff]  ;;  %v3286_v50 = vpack.c.bf16 %v381_v47, %v380_v46  ;;  %v630_v58 = vld [vmem:[%s3183_s21 + $0x24] sm:$0xff]  ;;  %v632_v61 = vld [vmem:[%s3183_s21 + $0x3c] sm:$0xff] }
  0x5b   : > { %2504 = vmatpush3.bf16.xpose.msk.msra.mxu1 %vm3175_vm3, %v2502_v15  ;;  %2473 = vmatprep.subr.bf16.mxu0 %v2927_v1  ;;  %v3288_v51 = vpack.c.bf16 %v364_v49, %v363_v48  ;;  %v628_v53 = vld [vmem:[%s3183_s21 + $0xc] sm:$0xff]  ;;  %v2534_v59 = vpack.c.bf16 %v630_v58, %v629_v57  ;;  %v631_v60 = vld [vmem:[%s3183_s21 + $0x34] sm:$0xff]  ;;  %v635_v5 = vld [vmem:[%s3183_s21 + $0x64] sm:$0xff] }
  0x5c   : > { %2505 = vmatprep.subr.bf16.mxu1 %v2927_v1  ;;  %v2530_v55 = vpack.c.bf16 %v628_v53, %v627_v52  ;;  %v2538_v62 = vpack.c.bf16 %v632_v61, %v631_v60  ;;  %v633_v63 = vld [vmem:[%s3183_s21 + $0x4c] sm:$0xff]  ;;  %v634_v0 = vld [vmem:[%s3183_s21 + $0x54] sm:$0xff]  ;;  %v637_v8 = vld [vmem:[%s3183_s21 + $0x7c] sm:$0xff] }
  0x5d   : > { %v2542_v4 = vpack.c.bf16 %v634_v0, %v633_v63  ;;  %v636_v6 = vld [vmem:[%s3183_s21 + $0x6c] sm:$0xff]  ;;  %v638_v9 = vld [vmem:[%s3183_s21 + $0x84] sm:$0xff]  ;;  %v639_v11 = vld [vmem:[%s3183_s21 + $0x94] sm:$0xff] }
  0x5e   : > { %v3347_v7 = vpack.c.bf16 %v636_v6, %v635_v5  ;;  %v3359_v10 = vpack.c.bf16 %v638_v9, %v637_v8  ;;  %v640_v12 = vld [vmem:[%s3183_s21 + $0x9c] sm:$0xff]  ;;  %v1798_v14 = vld [vmem:[%s3183_s21 + $0xc8] sm:$0xff]  ;;  %v642_v18 = vld [vmem:[%s3183_s21 + $0xb4] sm:$0xff] }
  0x5f   : > { %v1797_v13 = vld [vmem:[%s3183_s21 + $0xc0] sm:$0xff]  ;;  %v3373_v15 = vpack.c.bf16 %v640_v12, %v639_v11  ;;  %v641_v17 = vld [vmem:[%s3183_s21 + $0xac] sm:$0xff]  ;;  %v1799_v19 = vld [vmem:[%s3183_s21 + $0xd8] sm:$0xff] }
  0x60   : > { %v3375_v16 = vpack.c.bf16 %v1798_v14, %v1797_v13  ;;  %v3389_v22 = vpack.c.bf16 %v642_v18, %v641_v17  ;;  %v1765_v24 = vld [vmem:[%s3677_s1 + $0x10] sm:$0xff]  ;;  %v1801_v25 = vld [vmem:[%s3677_s1 + $0x18] sm:$0xff]  ;;  %v1834_v34 = vld [vmem:[%s3183_s21 + $0xe2] sm:$0xff] }
  0x61   : > { %v1866_v28 = vld [vmem:[%s3183_s21 + $0xcc] sm:$0xff]  ;;  %v1833_v31 = vld [vmem:[%s3183_s21 + $0xda] sm:$0xff]  ;;  %v1868_v36 = vld [vmem:[%s3183_s21 + $0xe4] sm:$0xff] }
  0x62   : > { %2476 = vmatpush3.bf16.xpose.msk.msra.mxu0 %vm3175_vm3, %v3209_v20  ;;  %v1867_v35 = vld [vmem:[%s3183_s21 + $0xdc] sm:$0xff]  ;;  %v2622_v37 = vpack.c.bf16 %v1834_v34, %v1833_v31  ;;  %v1869_v42 = vld [vmem:[%s3677_s1 + $0x28] sm:$0xff]  ;;  %v1904_v46 = vld [vmem:[%s3183_s21 + $0x110] sm:$0xff] }
  0x63   : > { %2508 = vmatpush3.bf16.xpose.msk.msra.mxu1 %vm3175_vm3, %v3211_v21  ;;  %2477 = vmatprep.subr.bf16.mxu0 %v2927_v1  ;;  %v3476_v40 = vpack.c.bf16 %v1868_v36, %v1867_v35  ;;  %v1835_v41 = vld [vmem:[%s3677_s1 + $0x20] sm:$0xff]  ;;  %v1937_v47 = vld [vmem:[%s3183_s21 + $0x10a] sm:$0xff]  ;;  %v1938_v48 = vld [vmem:[%s3183_s21 + $0x112] sm:$0xff] }
  0x64   : > { %2509 = vmatprep.subr.bf16.mxu1 %v2927_v1  ;;  %v1939_v52 = vld [vmem:[%s3677_s1 + $0x38] sm:$0xff]  ;;  %v1613_v58 = vld [vmem:[%s3678_s2] sm:$0xff] }
  0x65   : > { %v1970_v60 = vld [vmem:[%s3183_s21 + $0xfc] sm:$0xff]  ;;  %v1972_v63 = vld [vmem:[%s3183_s21 + $0x114] sm:$0xff] }
  0x6a   : > { %2480 = vmatpush3.bf16.xpose.msk.msra.mxu0 %vm3175_vm3, %v3225_v26 }
  0x6b   : > { %2512 = vmatpush3.bf16.xpose.msk.msra.mxu1 %vm3175_vm3, %v2510_v27  ;;  %2481 = vmatprep.subr.bf16.mxu0 %v2927_v1 }
  0x6c   : > { %2513 = vmatprep.subr.bf16.mxu1 %v2927_v1 }
  0x72   : > { %2484 = vmatpush3.bf16.xpose.msk.msra.mxu0 %vm3175_vm3, %v3238_v32 }
  0x73   : > { %2516 = vmatpush3.bf16.xpose.msk.msra.mxu1 %vm3175_vm3, %v3240_v33  ;;  %2485 = vmatprep.subr.bf16.mxu0 %v2927_v1 }
  0x74   : > { %2517 = vmatprep.subr.bf16.mxu1 %v2927_v1 }
  0x7a   : > { %2488 = vmatpush3.bf16.xpose.msk.msra.mxu0 %vm3175_vm3, %v3254_v38 }
  0x7b   : > { %2520 = vmatpush3.bf16.xpose.msk.msra.mxu1 %vm3175_vm3, %v3256_v39  ;;  %2489 = vmatprep.subr.bf16.mxu0 %v2927_v1 }
  0x7c   : > { %2521 = vmatprep.subr.bf16.mxu1 %v2927_v1 }
  0x82   : > { %2492 = vmatpush3.bf16.xpose.msk.msra.mxu0 %vm3175_vm3, %v3270_v44 }
  0x83   : > { %2524 = vmatpush3.bf16.xpose.msk.msra.mxu1 %vm3175_vm3, %v3272_v45  ;;  %2493 = vmatprep.subr.bf16.mxu0 %v2927_v1 }
  0x84   : > { %2525 = vmatprep.subr.bf16.mxu1 %v2927_v1 }
  0x8a   : > { %2496 = vmatpush3.bf16.xpose.msk.msra.mxu0 %vm3175_vm3, %v3286_v50 }
  0x8b   : > { %2528 = vmatpush3.bf16.xpose.msk.msra.mxu1 %vm3175_vm3, %v3288_v51  ;;  %2529 = vmatprep.subr.bf16.mxu0 %v2927_v1 }
  0x8c   : > { %2561 = vmatprep.subr.bf16.mxu1 %v2927_v1 }
  0x91   : > { %2183 = vmatmul.mubr.msk.f32.vlgmr.msra.gmra.mrb[0].mxu0 %vm384_vm2, %v1730_v54 }
  0x92   : > { %2218 = vmatmul.mubr.msk.f32.vlgmr.msra.gmra.mrb[0].mxu1 %vm384_vm2, %v365_v56  ;;  %2532 = vmatpush3.bf16.xpose.msk.msra.mxu0 %vm3175_vm3, %v2530_v55 }
  0x93   : > { %2564 = vmatpush3.bf16.xpose.msk.msra.mxu1 %vm3175_vm3, %v3211_v21  ;;  %2533 = vmatprep.subr.bf16.mxu0 %v2927_v1  ;;  %v1800_v21 = vld [vmem:[%s3183_s21 + $0xe0] sm:$0xff] }
  0x94   : > { %2565 = vmatprep.subr.bf16.mxu1 %v2927_v1  ;;  %2252 = vmatprep.mubr.msk.f32.mxu0 %vm2928_vm4, %v2929_v3  ;;  %v3391_v23 = vpack.c.bf16 %v1800_v21, %v1799_v19 }
  0x95   : > { %2287 = vmatprep.mubr.msk.f32.mxu1 %vm2928_vm4, %v2929_v3 }
  0x9a   : > { %2536 = vmatpush3.bf16.xpose.msk.msra.mxu0 %vm3175_vm3, %v2534_v59  ;;  %v1969_v59 = vld [vmem:[%s3183_s21 + $0xf4] sm:$0xff] }
  0x9b   : > { %2568 = vmatpush3.bf16.xpose.msk.msra.mxu1 %vm3175_vm3, %v2510_v27  ;;  %2537 = vmatprep.subr.bf16.mxu0 %v2927_v1  ;;  %v1865_v27 = vld [vmem:[%s3183_s21 + $0xc4] sm:$0xff]  ;;  %v2746_v61 = vpack.c.bf16 %v1970_v60, %v1969_v59 }
  0x9c   : > { %2569 = vmatprep.subr.bf16.mxu1 %v2927_v1  ;;  %v3463_v30 = vpack.c.bf16 %v1866_v28, %v1865_v27 }
  0xa2   : > { %2540 = vmatpush3.bf16.xpose.msk.msra.mxu0 %vm3175_vm3, %v2538_v62 }
  0xa3   : > { %2572 = vmatpush3.bf16.xpose.msk.msra.mxu1 %vm3175_vm3, %v3240_v33  ;;  %2541 = vmatprep.subr.bf16.mxu0 %v2927_v1 }
  0xa4   : > { %2573 = vmatprep.subr.bf16.mxu1 %v2927_v1 }
  0xaa   : > { %2544 = vmatpush3.bf16.xpose.msk.msra.mxu0 %vm3175_vm3, %v2542_v4 }
  0xab   : > { %2576 = vmatpush3.bf16.xpose.msk.msra.mxu1 %vm3175_vm3, %v3256_v39  ;;  %2545 = vmatprep.subr.bf16.mxu0 %v2927_v1 }
  0xac   : > { %2577 = vmatprep.subr.bf16.mxu1 %v2927_v1 }
  0xb2   : > { %2548 = vmatpush3.bf16.xpose.msk.msra.mxu0 %vm3175_vm3, %v3347_v7 }
  0xb3   : > { %2580 = vmatpush3.bf16.xpose.msk.msra.mxu1 %vm3175_vm3, %v3272_v45  ;;  %2549 = vmatprep.subr.bf16.mxu0 %v2927_v1 }
  0xb4   : > { %2581 = vmatprep.subr.bf16.mxu1 %v2927_v1 }
  0xba   : > { %2552 = vmatpush3.bf16.xpose.msk.msra.mxu0 %vm3175_vm3, %v3359_v10 }
  0xbb   : > { %2584 = vmatpush3.bf16.xpose.msk.msra.mxu1 %vm3175_vm3, %v3288_v51  ;;  %2553 = vmatprep.subr.bf16.mxu0 %v2927_v1 }
  0xbc   : > { %2585 = vmatprep.subr.bf16.mxu1 %v2927_v1 }
  0xc2   : > { %2556 = vmatpush3.bf16.xpose.msk.msra.mxu0 %vm3175_vm3, %v3373_v15 }
  0xc3   : > { %2588 = vmatpush3.bf16.xpose.msk.msra.mxu1 %vm3175_vm3, %v3375_v16  ;;  %2557 = vmatprep.subr.bf16.mxu0 %v2927_v1 }
  0xc4   : > { %2589 = vmatprep.subr.bf16.mxu1 %v2927_v1 }
  0xca   : > { %2560 = vmatpush3.bf16.xpose.msk.msra.mxu0 %vm3175_vm3, %v3389_v22 }
  0xcb   : > { %2592 = vmatpush3.bf16.xpose.msk.msra.mxu1 %vm3175_vm3, %v3391_v23  ;;  %2593 = vmatprep.subr.bf16.mxu0 %v2927_v1 }
  0xcc   : > { %2625 = vmatprep.subr.bf16.mxu1 %v2927_v1 }
  0xd1   : > { %2253 = vmatmul.mubr.msk.f32.vlgmr.msra.gmra.mrb[2].mxu0 %vm384_vm2, %v1765_v24 }
  0xd2   : > { %2596 = vmatpush3.bf16.xpose.msk.msra.mxu0 %vm3175_vm3, %v3209_v20  ;;  %2288 = vmatmul.mubr.msk.f32.vlgmr.msra.gmra.mrb[2].mxu1 %vm384_vm2, %v1801_v25  ;;  %v1831_v20 = vld [vmem:[%s3183_s21 + $0xc2] sm:$0xff] }
  0xd3   : > { %2628 = vmatpush3.bf16.xpose.msk.msra.mxu1 %vm3175_vm3, %v2538_v62  ;;  %2597 = vmatprep.subr.bf16.mxu0 %v2927_v1  ;;  %v1971_v62 = vld [vmem:[%s3183_s21 + $0x10c] sm:$0xff] }
  0xd4   : > { %2629 = vmatprep.subr.bf16.mxu1 %v2927_v1  ;;  %2322 = vmatprep.mubr.msk.f32.mxu0 %vm2928_vm4, %v2929_v3  ;;  %v2750_v0 = vpack.c.bf16 %v1972_v63, %v1971_v62 }
  0xd5   : > { %2357 = vmatprep.mubr.msk.f32.mxu1 %vm2928_vm4, %v2929_v3 }
  0xda   : > { %2600 = vmatpush3.bf16.xpose.msk.msra.mxu0 %vm3175_vm3, %v3225_v26  ;;  %v1832_v26 = vld [vmem:[%s3183_s21 + $0xca] sm:$0xff] }
  0xdb   : > { %2632 = vmatpush3.bf16.xpose.msk.msra.mxu1 %vm3175_vm3, %v2542_v4  ;;  %2601 = vmatprep.subr.bf16.mxu0 %v2927_v1  ;;  %v2618_v29 = vpack.c.bf16 %v1832_v26, %v1831_v20  ;;  %v1973_v4 = vld [vmem:[%s3677_s1 + $0x40] sm:$0xff] }
  0xdc   : > { %2633 = vmatprep.subr.bf16.mxu1 %v2927_v1 }
  0xe2   : > { %2604 = vmatpush3.bf16.xpose.msk.msra.mxu0 %vm3175_vm3, %v3238_v32 }
  0xe3   : > { %2636 = vmatpush3.bf16.xpose.msk.msra.mxu1 %vm3175_vm3, %v3347_v7  ;;  %2605 = vmatprep.subr.bf16.mxu0 %v2927_v1 }
  0xe4   : > { %2637 = vmatprep.subr.bf16.mxu1 %v2927_v1 }
  0xea   : > { %2608 = vmatpush3.bf16.xpose.msk.msra.mxu0 %vm3175_vm3, %v3254_v38 }
  0xeb   : > { %2640 = vmatpush3.bf16.xpose.msk.msra.mxu1 %vm3175_vm3, %v3359_v10  ;;  %2609 = vmatprep.subr.bf16.mxu0 %v2927_v1 }
  0xec   : > { %2641 = vmatprep.subr.bf16.mxu1 %v2927_v1 }
  0xf2   : > { %2612 = vmatpush3.bf16.xpose.msk.msra.mxu0 %vm3175_vm3, %v3270_v44 }
  0xf3   : > { %2644 = vmatpush3.bf16.xpose.msk.msra.mxu1 %vm3175_vm3, %v3373_v15  ;;  %2613 = vmatprep.subr.bf16.mxu0 %v2927_v1 }
  0xf4   : > { %2645 = vmatprep.subr.bf16.mxu1 %v2927_v1 }
  0xfa   : > { %2616 = vmatpush3.bf16.xpose.msk.msra.mxu0 %vm3175_vm3, %v3286_v50 }
  0xfb   : > { %2648 = vmatpush3.bf16.xpose.msk.msra.mxu1 %vm3175_vm3, %v3389_v22  ;;  %2617 = vmatprep.subr.bf16.mxu0 %v2927_v1 }
  0xfc   : > { %2649 = vmatprep.subr.bf16.mxu1 %v2927_v1 }
 0x102   : > { %2620 = vmatpush3.bf16.xpose.msk.msra.mxu0 %vm3175_vm3, %v2618_v29 }
 0x103   : > { %2652 = vmatpush3.bf16.xpose.msk.msra.mxu1 %vm3175_vm3, %v3463_v30  ;;  %2621 = vmatprep.subr.bf16.mxu0 %v2927_v1 }
 0x104   : > { %2653 = vmatprep.subr.bf16.mxu1 %v2927_v1 }
 0x10a   : > { %2624 = vmatpush3.bf16.xpose.msk.msra.mxu0 %vm3175_vm3, %v2622_v37 }
 0x10b   : > { %2656 = vmatpush3.bf16.xpose.msk.msra.mxu1 %vm3175_vm3, %v3476_v40  ;;  %2657 = vmatprep.subr.bf16.mxu0 %v2927_v1 }
 0x10c   : > { %2689 = vmatprep.subr.bf16.mxu1 %v2927_v1 }
 0x111   : > { %2323 = vmatmul.mubr.msk.f32.vlgmr.msra.gmra.mrb[4].mxu0 %vm384_vm2, %v1835_v41 }
 0x112   : > { %2660 = vmatpush3.bf16.xpose.msk.msra.mxu0 %vm3175_vm3, %v3240_v33  ;;  %2358 = vmatmul.mubr.msk.f32.vlgmr.msra.gmra.mrb[4].mxu1 %vm384_vm2, %v1869_v42  ;;  %v1902_v33 = vld [vmem:[%s3183_s21 + $0xf8] sm:$0xff] }
 0x113   : > { %2692 = vmatpush3.bf16.xpose.msk.msra.mxu1 %vm3175_vm3, %v3238_v32  ;;  %2661 = vmatprep.subr.bf16.mxu0 %v2927_v1  ;;  %v1901_v32 = vld [vmem:[%s3183_s21 + $0xf0] sm:$0xff] }
 0x114   : > { %2693 = vmatprep.subr.bf16.mxu1 %v2927_v1  ;;  %2392 = vmatprep.mubr.msk.f32.mxu0 %vm2928_vm4, %v2929_v3  ;;  %v2682_v43 = vpack.c.bf16 %v1902_v33, %v1901_v32 }
 0x115   : > { %2427 = vmatprep.mubr.msk.f32.mxu1 %vm2928_vm4, %v2929_v3 }
 0x11a   : > { %2664 = vmatpush3.bf16.xpose.msk.msra.mxu0 %vm3175_vm3, %v3256_v39  ;;  %v1936_v39 = vld [vmem:[%s3183_s21 + $0xfa] sm:$0xff] }
 0x11b   : > { %2696 = vmatpush3.bf16.xpose.msk.msra.mxu1 %vm3175_vm3, %v3254_v38  ;;  %2665 = vmatprep.subr.bf16.mxu0 %v2927_v1  ;;  %v1935_v38 = vld [vmem:[%s3183_s21 + $0xf2] sm:$0xff] }
 0x11c   : > { %2697 = vmatprep.subr.bf16.mxu1 %v2927_v1 }
 0x122   : > { %2668 = vmatpush3.bf16.xpose.msk.msra.mxu0 %vm3175_vm3, %v3272_v45  ;;  %v1903_v45 = vld [vmem:[%s3183_s21 + $0x108] sm:$0xff]  ;;  %s1992_s21 = sshll.u32 %s2912_s16, 1  ;;  %s2830_s16 = scalar_lea.vmem %s3621_s28, 128 }
 0x123   : > { %2700 = vmatpush3.bf16.xpose.msk.msra.mxu1 %vm3175_vm3, %v3270_v44  ;;  %2669 = vmatprep.subr.bf16.mxu0 %v2927_v1  ;;  %v2714_v44 = vpack.c.bf16 %v1936_v39, %v1935_v38  ;;  %v2686_v49 = vpack.c.bf16 %v1904_v46, %v1903_v45  ;;  %s1633_s24 = sadd.s32 %s2908_s15, %s1992_s21  ;;  %s1622_s15 = scalar_lea.sflag [#allocation4], %s175_s4 }
 0x124   : > { %2701 = vmatprep.subr.bf16.mxu1 %v2927_v1  ;;  %s1993_s27 = sshll.u32 %s1633_s24, 7  ;;  %p2831_p0 = scmp.ne.s32.totalorder %s3621_s28, %s2830_s16 }
 0x125   : > { %s3619_s7 = scalar_lea.hbm %s3679_s3, %s1993_s27  ;;  %p2838_p5 = scmp.lt.s32.totalorder %s2836_s10, %s2830_s16 }
 0x126   : > { %p2832_p1 = pnand %p2831_p0, %p3003_p3 }
 0x127   : > { %p2839_p6 = por %p2838_p5, %p2837_p4 }
 0x128   : > { %p2833_p2 = pneg %p2832_p1 }
 0x12a   : > { %2672 = vmatpush3.bf16.xpose.msk.msra.mxu0 %vm3175_vm3, %v3288_v51  ;;  %v1905_v51 = vld [vmem:[%s3677_s1 + $0x30] sm:$0xff]  ;;  %p2840_p7 = pnand %p2839_p6, %p2833_p2 }
 0x12b   : > { %2704 = vmatpush3.bf16.xpose.msk.msra.mxu1 %vm3175_vm3, %v3286_v50  ;;  %2673 = vmatprep.subr.bf16.mxu0 %v2927_v1  ;;  %v2718_v50 = vpack.c.bf16 %v1938_v48, %v1937_v47 }
 0x12c   : > { %2705 = vmatprep.subr.bf16.mxu1 %v2927_v1 }
 0x132   : > { %2676 = vmatpush3.bf16.xpose.msk.msra.mxu0 %vm3175_vm3, %v3375_v16 }
 0x133   : > { %2708 = vmatpush3.bf16.xpose.msk.msra.mxu1 %vm3175_vm3, %v2618_v29  ;;  %2677 = vmatprep.subr.bf16.mxu0 %v2927_v1 }
 0x134   : > { %2709 = vmatprep.subr.bf16.mxu1 %v2927_v1 }
 0x13a   : > { %2680 = vmatpush3.bf16.xpose.msk.msra.mxu0 %vm3175_vm3, %v3391_v23 }
 0x13b   : > { %2712 = vmatpush3.bf16.xpose.msk.msra.mxu1 %vm3175_vm3, %v2622_v37  ;;  %2681 = vmatprep.subr.bf16.mxu0 %v2927_v1 }
 0x13c   : > { %2713 = vmatprep.subr.bf16.mxu1 %v2927_v1 }
 0x142   : > { %2684 = vmatpush3.bf16.xpose.msk.msra.mxu0 %vm3175_vm3, %v2682_v43 }
 0x143   : > { %2716 = vmatpush3.bf16.xpose.msk.msra.mxu1 %vm3175_vm3, %v2714_v44  ;;  %2685 = vmatprep.subr.bf16.mxu0 %v2927_v1 }
 0x144   : > { %2717 = vmatprep.subr.bf16.mxu1 %v2927_v1 }
 0x14a   : > { %2688 = vmatpush3.bf16.xpose.msk.msra.mxu0 %vm3175_vm3, %v2686_v49 }
 0x14b   : > { %2720 = vmatpush3.bf16.xpose.msk.msra.mxu1 %vm3175_vm3, %v2718_v50  ;;  %2721 = vmatprep.subr.bf16.mxu0 %v2927_v1 }
 0x151   : > { %2393 = vmatmul.mubr.msk.f32.vlgmr.msra.gmra.mrb[6].mxu0 %vm384_vm2, %v1905_v51 }
 0x152   : > { %2724 = vmatpush3.bf16.xpose.msk.msra.mxu0 %vm3175_vm3, %v3347_v7  ;;  %2428 = vmatmul.mubr.msk.f32.vlgmr.msra.gmra.mrb[6].mxu1 %vm384_vm2, %v1939_v52 }
 0x153   : > { %2725 = vmatprep.subr.bf16.mxu0 %v2927_v1  ;;  %2462 = vmatprep.mubr.msk.f32.mxu0 %vm2928_vm4, %v2929_v3  ;;  %v2930_v3 = vmov 0  }
 0x154   : > { %2829 = vset.pattern.permute.xlu0 %v2930_v3 }
 0x155   : > { %1616 = vperm.xlu0 %2829, %v1613_v58  }
 0x15a   : > { %2728 = vmatpush3.bf16.xpose.msk.msra.mxu0 %vm3175_vm3, %v3359_v10 }
 0x15b   : > { %2729 = vmatprep.subr.bf16.mxu0 %v2927_v1 }
 0x162   : > { %2732 = vmatpush3.bf16.xpose.msk.msra.mxu0 %vm3175_vm3, %v3373_v15 }
 0x163   : > { %2733 = vmatprep.subr.bf16.mxu0 %v2927_v1 }
 0x164   : > { %v502_v53 = vpop.f32.mrb[0].mxu0 }
 0x165   : > { %v2184_v54 = vpop.f32.mrb[1].mxu0  ;;  %v623_v55 = vpop.f32.mrb[0].mxu1 }
 0x166   : > { %v624_v56 = vadd.f32 %v623_v55, %v502_v53  ;;  %v2219_v57 = vpop.f32.mrb[1].mxu1 }
 0x16a   : > { %2736 = vmatpush3.bf16.xpose.msk.msra.mxu0 %vm3175_vm3, %v3389_v22 }
 0x16b   : > { %2737 = vmatprep.subr.bf16.mxu0 %v2927_v1 }
 0x172   : > { %2740 = vmatpush3.bf16.xpose.msk.msra.mxu0 %vm3175_vm3, %v3463_v30 }
 0x173   : > { %2741 = vmatprep.subr.bf16.mxu0 %v2927_v1 }
 0x17a   : > { %2744 = vmatpush3.bf16.xpose.msk.msra.mxu0 %vm3175_vm3, %v3476_v40 }
 0x17b   : > { %2745 = vmatprep.subr.bf16.mxu0 %v2927_v1 }
 0x182   : > { %2748 = vmatpush3.bf16.xpose.msk.msra.mxu0 %vm3175_vm3, %v2746_v61 }
 0x183   : > { %2749 = vmatprep.subr.bf16.mxu0 %v2927_v1 }
 0x18a   : > { %2752 = vmatpush3.bf16.xpose.msk.msra.mxu0 %vm3175_vm3, %v2750_v0 }
 0x191   : > { %2463 = vmatmul.mubr.msk.f32.vlgmr.msra.gmra.mrb[8].mxu0 %vm384_vm2, %v1973_v4 }
 0x1a4   : > { %v762_v5 = vpop.f32.mrb[2].mxu0 }
 0x1a5   : > { %v766_v6 = vadd.f32 %v762_v5, %v624_v56  ;;  %v2254_v7 = vpop.f32.mrb[3].mxu0  ;;  %v905_v8 = vpop.f32.mrb[2].mxu1 }
 0x1a6   : > { %v2289_v9 = vpop.f32.mrb[3].mxu1 }
 0x1a7   : > { %v909_v1 = vadd.f32 %v905_v8, %v766_v6 }
 0x1d4   : > { %v1617_v23 = vpop.permute.xlu0 %1616 }
 0x1e4   : > { %v1045_v10 = vpop.f32.mrb[4].mxu0 }
 0x1e5   : > { %v1049_v11 = vadd.f32 %v1045_v10, %v909_v1  ;;  %v2324_v12 = vpop.f32.mrb[5].mxu0  ;;  %v1185_v2 = vpop.f32.mrb[4].mxu1 }
 0x1e6   : > { %v2359_v13 = vpop.f32.mrb[5].mxu1 }
 0x1e7   : > { %v1189_v14 = vadd.f32 %v1185_v2, %v1049_v11 }
 0x224   : > { %v1328_v15 = vpop.f32.mrb[6].mxu0 }
 0x225   : > { %v1332_v16 = vadd.f32 %v1328_v15, %v1189_v14  ;;  %v2394_v17 = vpop.f32.mrb[7].mxu0  ;;  %v1468_v18 = vpop.f32.mrb[6].mxu1 }
 0x226   : > { %v2429_v19 = vpop.f32.mrb[7].mxu1 }
 0x227   : > { %v1472_v21 = vadd.f32 %v1468_v18, %v1332_v16 }
 0x264   : > { %v1608_v22 = vpop.f32.mrb[8].mxu0 }
 0x265   : > { %v1612_v24 = vadd.f32 %v1608_v22, %v1472_v21  ;;  %v2464_v25 = vpop.f32.mrb[9].mxu0 }
 0x267   : > { %v1619_v20 = vadd.f32 %v1617_v23, %v1612_v24 }
 0x269   : > { %1620 = vst [vmem:[%s177_s11] sm:$0xff] %v1619_v20 }
 0x26a   : > { %2843 = shalt.err (!%p2840_p7)
}
 0x26b   : > { %s2844_s4 = scalar_lea.hbm %s3619_s7, 128  ;;  %s2848_s20 = scalar_lea.hbm %s3679_s3, 512 }
 0x26c   : > { %p2845_p9 = scmp.ne.s32.totalorder %s3619_s7, %s2844_s4  ;;  %p2849_p12 = scmp.lt.u32.totalorder %s3619_s7, %s3679_s3 }
 0x26d   : > { %p2850_p13 = scmp.lt.u32.totalorder %s2848_s20, %s2844_s4  ;;  %p2852_p1 = scmp.lt.u32.totalorder %s2844_s4, %s3619_s7 }
 0x26e   : > { %p2846_p10 = pnand %p2845_p9, %p3003_p3 }
 0x26f   : > { %p2851_p0 = por %p2850_p13, %p2849_p12 }
 0x270   : > { %p2847_p11 = pneg %p2846_p10 }
 0x271   : > { %p2853_p2 = por %p2852_p1, %p2851_p0 }
 0x273   : > { %p2854_p4 = pnand %p2853_p2, %p2847_p11 }
 0x275   : > { %2857 = shalt.err (!%p2854_p4)
}
 0x276   : > { %2753 = dma.vmem_to_hbm [thread:$0]  (%p3003_p3), %s3621_s28, 128, %s3619_s7, %s1622_s15  }
 0x277 PF: > { %p2759_p5 = scmp.ge.s32.totalorder %s2924_s19, 2  ;;  %s1649_s27 = sand.u32 1, %s2896_s12  }
 0x278   : > { %s1650_s29 = scalar_lea.sflag [#allocation4], %s1649_s27 }
 0x279   : > { %p2756_p6 = pnand %p2759_p5, %p3012_p8 }
 0x27b   : > { %2891 = dma.done.wait (!%p2756_p6), %s1650_s29, 128  }
 0x27c   : > { %2893 = vsyncadd (!%p2756_p6), %s1650_s29, 4294967168  ;;  %s16_s19 = sadd.s32 1, %s2924_s19   ;;  %s3684_s12 = smov %s2900_s13 }
 0x27d   : > { %p13_p7 = scmp.ge.s32.totalorder %s16_s19, 6   ;;  %s3685_s13 = smov %s2904_s14 }
 0x27e   : > { %s3686_s14 = smov %s3021_s30  ;;  %s3687_s15 = smov %s2916_s17 }
 0x27f   : > { %s3688_s16 = smov %s2920_s18  ;;  %s3689_s17 = smov %s3692_s22 }
 0x280   : > { %s3690_s18 = smov %s3696_s23  ;;  %15 = sbr.rel (!%p13_p7) target bundleno = 5 (0x5), region = 83 }
 0x287   :  { %1655 = vsyncpa [#allocation4], 1 }
 0x288   :  { %1657 = vsyncpa [#allocation4 + $0x1], 1 }

</bundles_post_ra>
